<compile_context>
chip_gen: v7x
topology: tpu7x:2x2x1
jax: 0.10.0
libtpu: 0.0.40
codegen_flags: <defaults>
</compile_context>

<pallas_src>
import functools

import jax
import jax.numpy as jnp
import numpy as np
from jax import lax
from jax.experimental import pallas as pl
from jax.experimental.pallas import tpu as pltpu


def _conv_bn_prelu_kernel(x0_ref, x1_ref, w_ref, scale_ref, shift_ref, alpha_ref,
                          o_ref, *, K, Wp, tm):
    # x0_ref: (C_in, tm)  current tile of the flattened padded image.
    # x1_ref: (C_in, tm)  next tile (supplies the K-1 row / K-1 col halo).
    # w_ref:  (C_out, K*K*C_in) bf16 weights.
    # o_ref:  (C_out, tm) lane-dense output tile (flattened h*Wp + w pixels).
    xw = jnp.concatenate([x0_ref[...], x1_ref[...]], axis=1)          # (C_in, 2*tm) f32

    # im2col patch block: row index = (kh*K + kw)*C_in + c, lane = output pixel.
    # All slices are static lane offsets (d <= (K-1)*(Wp+1) <= tm).
    pieces = []
    for kh in range(K):
        for kw in range(K):
            d = kh * Wp + kw
            pieces.append(xw[:, d:d + tm])                            # (C_in, tm)
    patches = jnp.concatenate(pieces, axis=0).astype(jnp.bfloat16)    # (K*K*C_in, tm)

    # Single deep-contraction MXU matmul, bf16 in, f32 accumulate.
    acc = jnp.dot(w_ref[...], patches,
                  preferred_element_type=jnp.float32)                 # (C_out, tm)

    # Folded conv-bias + BatchNorm (eval mode), per output channel.
    acc = acc * scale_ref[...] + shift_ref[...]

    # PReLU (activation='relu'), single shared alpha from SMEM.
    alpha = alpha_ref[0]
    acc = jnp.where(acc >= 0.0, acc, alpha * acc)

    o_ref[...] = acc.astype(o_ref.dtype)


def conv_layer_forward(x_nchw, w_oihw, bias, bn_params, prelu_alpha, *,
                       stride=1, tm=128):
    B, C_in, H, W = x_nchw.shape
    C_out, _, K, _ = w_oihw.shape
    # TODO(synk): stride > 1 would need a strided im2col; only stride=1 implemented.
    assert stride == 1, "only stride=1 implemented in the Pallas kernel"

    p = K // 2
    # ReflectionPad2d (matches PyTorch).
    # TODO(synk): fold the reflection halo into an in-kernel DMA to avoid this HBM pass.
    x_pad = jnp.pad(x_nchw, ((0, 0), (0, 0), (p, p), (p, p)), mode="reflect")
    Hp, Wp = H + 2 * p, W + 2 * p
    H_out, W_out = Hp - K + 1, Wp - K + 1

    d_max = (K - 1) * (Wp + 1)                       # largest im2col tap offset (flat axis)
    tm = max(tm, ((d_max + 127) // 128) * 128)       # halo must fit in one extra tile
    M_out = H_out * Wp                               # flattened outputs (incl. junk columns)
    n_t = (M_out + tm - 1) // tm
    M_pad = n_t * tm
    N_in = M_pad + tm                                # room for the (t+1) halo block

    # NCHW stays put: flatten padded spatial dims so output pixels live on lanes.
    x_flat = x_pad.reshape(B, C_in, Hp * Wp)
    x_flat = jnp.pad(x_flat, ((0, 0), (0, 0), (0, N_in - Hp * Wp)))

    # OIHW -> (C_out, K*K*C_in); row order matches the kernel's (kh, kw, c) patch rows.
    w_mat = jnp.transpose(w_oihw, (0, 2, 3, 1)).reshape(C_out, K * K * C_in)
    w_mat = w_mat.astype(jnp.bfloat16)

    gamma, beta, r_mean, r_var, eps = bn_params
    scale = gamma / jnp.sqrt(r_var + eps)
    shift = beta + (bias - r_mean) * scale           # conv bias folded into the BN shift
    scale2 = scale.reshape(C_out, 1).astype(jnp.float32)
    shift2 = shift.reshape(C_out, 1).astype(jnp.float32)
    alpha1 = jnp.asarray(prelu_alpha, jnp.float32).reshape(1)

    kernel = functools.partial(_conv_bn_prelu_kernel, K=K, Wp=Wp, tm=tm)

    out_flat = pl.pallas_call(
        kernel,
        out_shape=jax.ShapeDtypeStruct((B, C_out, M_pad), jnp.float32),
        grid_spec=pltpu.PrefetchScalarGridSpec(
            num_scalar_prefetch=0,
            grid=(B, n_t),
            in_specs=[
                pl.BlockSpec((None, C_in, tm), lambda b, t: (b, 0, t)),      # tile
                pl.BlockSpec((None, C_in, tm), lambda b, t: (b, 0, t + 1)),  # halo tile
                pl.BlockSpec((C_out, K * K * C_in), lambda b, t: (0, 0)),    # weights
                pl.BlockSpec((C_out, 1), lambda b, t: (0, 0)),               # BN scale
                pl.BlockSpec((C_out, 1), lambda b, t: (0, 0)),               # BN shift (+bias)
                pl.BlockSpec(memory_space=pltpu.MemorySpace.SMEM),           # PReLU alpha
            ],
            out_specs=pl.BlockSpec((None, C_out, tm), lambda b, t: (b, 0, t)),
        ),
        compiler_params=pltpu.CompilerParams(
            dimension_semantics=("parallel", "parallel")),
    )(x_flat, x_flat, w_mat, scale2, shift2, alpha1)

    # Undo the flattening: keep the first W_out of every Wp columns.  No transpose needed.
    out = out_flat[:, :, :M_out].reshape(B, C_out, H_out, Wp)[:, :, :, :W_out]
    return out


def reference(x_nchw, w_oihw, bias, bn_params, prelu_alpha):
    """Pure-JAX f32 reference of the same forward pass (for correctness check)."""
    K = w_oihw.shape[-1]
    p = K // 2
    xp = jnp.pad(x_nchw, ((0, 0), (0, 0), (p, p), (p, p)), mode="reflect")
    y = lax.conv_general_dilated(xp, w_oihw, (1, 1), "VALID",
                                 dimension_numbers=("NCHW", "OIHW", "NCHW"))
    y = y + bias.reshape(1, -1, 1, 1)
    gamma, beta, r_mean, r_var, eps = bn_params
    y = (y - r_mean.reshape(1, -1, 1, 1)) / jnp.sqrt(r_var.reshape(1, -1, 1, 1) + eps)
    y = y * gamma.reshape(1, -1, 1, 1) + beta.reshape(1, -1, 1, 1)
    y = jnp.where(y >= 0.0, y, prelu_alpha * y)
    return y


if __name__ == "__main__":
    key = jax.random.PRNGKey(0)
    B, C_in, H, W = 2, 4, 16, 16
    C_out, K, stride = 8, 3, 1

    k1, k2, k3, k4, k5 = jax.random.split(key, 5)
    x = jax.random.normal(k1, (B, C_in, H, W), jnp.float32)

    # nn.Conv2d(C_in, C_out, K, stride) style init.
    fan_in = C_in * K * K
    bound = 1.0 / np.sqrt(fan_in)
    w = jax.random.uniform(k2, (C_out, C_in, K, K), jnp.float32, -bound, bound)
    bias = jax.random.uniform(k3, (C_out,), jnp.float32, -bound, bound)

    # BatchNorm2d(C_out, eps=1e-5, affine=True) in eval mode, non-trivial affine params.
    gamma = jax.random.uniform(k4, (C_out,), jnp.float32, 0.5, 1.5)
    beta = 0.1 * jax.random.normal(k5, (C_out,), jnp.float32)
    r_mean = jnp.zeros((C_out,), jnp.float32)
    r_var = jnp.ones((C_out,), jnp.float32)
    eps = 1e-5
    bn_params = (gamma, beta, r_mean, r_var, eps)

    prelu_alpha = 0.25  # PyTorch nn.PReLU() default

    out = conv_layer_forward(x, w, bias, bn_params, prelu_alpha, stride=stride)
    out = jax.block_until_ready(out)

    ref = reference(x, w, bias, bn_params, prelu_alpha)
    # bf16 matmul operands (f32 accumulation) -> slightly looser tolerance than pure f32.
    np.testing.assert_allclose(np.asarray(out), np.asarray(ref), rtol=2e-2, atol=2e-2)
    print("KERNEL_OK")
</pallas_src>

<mosaic_0001>
module attributes {stable_mosaic.version = 11 : i64} {
  func.func @_conv_bn_prelu_kernel(%arg0: i32, %arg1: i32, %arg2: memref<1x4x128xf32, #tpu.memory_space<vmem>>, %arg3: memref<1x4x128xf32, #tpu.memory_space<vmem>>, %arg4: memref<8x36xbf16, #tpu.memory_space<vmem>>, %arg5: memref<8x1xf32, #tpu.memory_space<vmem>>, %arg6: memref<8x1xf32, #tpu.memory_space<vmem>>, %arg7: memref<1xf32, #tpu.memory_space<smem>>, %arg8: memref<1x8x128xf32, #tpu.memory_space<vmem>>) attributes {dimension_semantics = [#tpu.dimension_semantics<parallel>, #tpu.dimension_semantics<parallel>], iteration_bounds = array<i64: 2, 3>, scalar_prefetch = 0 : i64, scratch_operands = 0 : i64, tpu.core_type = #tpu.core_type<tc>, window_params = [{transform_indices = @transform_0, window_bounds = array<i64: 1, 4, 128>}, {transform_indices = @transform_1, window_bounds = array<i64: 1, 4, 128>}, {pipeline_mode = #tpu.pipeline_mode<synchronous>, transform_indices = @transform_2, window_bounds = array<i64: 8, 36>}, {pipeline_mode = #tpu.pipeline_mode<synchronous>, transform_indices = @transform_3, window_bounds = array<i64: 8, 1>}, {pipeline_mode = #tpu.pipeline_mode<synchronous>, transform_indices = @transform_4, window_bounds = array<i64: 8, 1>}, {transform_indices = @transform_5, window_bounds = array<i64: 1>}, {transform_indices = @transform_6, window_bounds = array<i64: 1, 8, 128>}]} {
    %c0 = arith.constant 0 : index
    %c0_0 = arith.constant 0 : index
    %c0_1 = arith.constant 0 : index
    %0 = vector.load %arg2[%c0, %c0_0, %c0_1] : memref<1x4x128xf32, #tpu.memory_space<vmem>>, vector<1x4x128xf32>
    %1 = vector.shape_cast %0 : vector<1x4x128xf32> to vector<4x128xf32>
    %c0_2 = arith.constant 0 : index
    %c0_3 = arith.constant 0 : index
    %c0_4 = arith.constant 0 : index
    %2 = vector.load %arg3[%c0_2, %c0_3, %c0_4] : memref<1x4x128xf32, #tpu.memory_space<vmem>>, vector<1x4x128xf32>
    %3 = vector.shape_cast %2 : vector<1x4x128xf32> to vector<4x128xf32>
    %4 = tpu.concatenate %1, %3 in 1 : vector<4x128xf32>, vector<4x128xf32> -> vector<4x256xf32>
    %5 = vector.extract_strided_slice %4 {offsets = [0, 0], sizes = [4, 128], strides = [1, 1]} : vector<4x256xf32> to vector<4x128xf32>
    %6 = vector.extract_strided_slice %4 {offsets = [0, 1], sizes = [4, 128], strides = [1, 1]} : vector<4x256xf32> to vector<4x128xf32>
    %7 = vector.extract_strided_slice %4 {offsets = [0, 2], sizes = [4, 128], strides = [1, 1]} : vector<4x256xf32> to vector<4x128xf32>
    %8 = vector.extract_strided_slice %4 {offsets = [0, 18], sizes = [4, 128], strides = [1, 1]} : vector<4x256xf32> to vector<4x128xf32>
    %9 = vector.extract_strided_slice %4 {offsets = [0, 19], sizes = [4, 128], strides = [1, 1]} : vector<4x256xf32> to vector<4x128xf32>
    %10 = vector.extract_strided_slice %4 {offsets = [0, 20], sizes = [4, 128], strides = [1, 1]} : vector<4x256xf32> to vector<4x128xf32>
    %11 = vector.extract_strided_slice %4 {offsets = [0, 36], sizes = [4, 128], strides = [1, 1]} : vector<4x256xf32> to vector<4x128xf32>
    %12 = vector.extract_strided_slice %4 {offsets = [0, 37], sizes = [4, 128], strides = [1, 1]} : vector<4x256xf32> to vector<4x128xf32>
    %13 = vector.extract_strided_slice %4 {offsets = [0, 38], sizes = [4, 128], strides = [1, 1]} : vector<4x256xf32> to vector<4x128xf32>
    %14 = tpu.concatenate %5, %6, %7, %8, %9, %10, %11, %12, %13 in 0 : vector<4x128xf32>, vector<4x128xf32>, vector<4x128xf32>, vector<4x128xf32>, vector<4x128xf32>, vector<4x128xf32>, vector<4x128xf32>, vector<4x128xf32>, vector<4x128xf32> -> vector<36x128xf32>
    %15 = arith.truncf %14 : vector<36x128xf32> to vector<36x128xbf16>
    %c0_5 = arith.constant 0 : index
    %c0_6 = arith.constant 0 : index
    %16 = vector.load %arg4[%c0_5, %c0_6] : memref<8x36xbf16, #tpu.memory_space<vmem>>, vector<8x36xbf16>
    %cst = arith.constant dense<0.000000e+00> : vector<8x128xf32>
    %17 = tpu.matmul %16, %15, %cst {dimension_numbers = #tpu.dot_dimension_numbers<[1], [0], [0], [1], [0, 0, 1, 1], [], []>} : vector<8x36xbf16>, vector<36x128xbf16>, vector<8x128xf32> -> vector<8x128xf32>
    %c0_7 = arith.constant 0 : index
    %c0_8 = arith.constant 0 : index
    %18 = vector.load %arg5[%c0_7, %c0_8] : memref<8x1xf32, #tpu.memory_space<vmem>>, vector<8x1xf32>
    %19 = vector.broadcast %18 : vector<8x1xf32> to vector<8x128xf32>
    %20 = arith.mulf %17, %19 : vector<8x128xf32>
    %c0_9 = arith.constant 0 : index
    %c0_10 = arith.constant 0 : index
    %21 = vector.load %arg6[%c0_9, %c0_10] : memref<8x1xf32, #tpu.memory_space<vmem>>, vector<8x1xf32>
    %22 = vector.broadcast %21 : vector<8x1xf32> to vector<8x128xf32>
    %23 = arith.addf %20, %22 : vector<8x128xf32>
    %c0_11 = arith.constant 0 : index
    %24 = memref.load %arg7[%c0_11] : memref<1xf32, #tpu.memory_space<smem>>
    %cst_12 = arith.constant 0.000000e+00 : f32
    %25 = vector.broadcast %cst_12 : f32 to vector<8x128xf32>
    %26 = arith.cmpf oge, %23, %25 : vector<8x128xf32>
    %27 = vector.broadcast %24 : f32 to vector<8x128xf32>
    %28 = arith.mulf %27, %23 : vector<8x128xf32>
    %29 = arith.select %26, %23, %28 : vector<8x128xi1>, vector<8x128xf32>
    %c0_13 = arith.constant 0 : index
    %c0_14 = arith.constant 0 : index
    %c0_15 = arith.constant 0 : index
    %30 = vector.load %arg8[%c0_13, %c0_14, %c0_15] : memref<1x8x128xf32, #tpu.memory_space<vmem>>, vector<1x8x128xf32>
    %31 = vector.shape_cast %30 : vector<1x8x128xf32> to vector<8x128xf32>
    %32 = vector.shape_cast %29 : vector<8x128xf32> to vector<1x8x128xf32>
    tpu.vector_store %arg8[%c0_13, %c0_14, %c0_15], %32 {strides = array<i32>} : memref<1x8x128xf32, #tpu.memory_space<vmem>>, vector<1x8x128xf32>,
    return
  }
  func.func @transform_0(%arg0: i32, %arg1: i32) -> (i32, i32, i32) {
    %c0_i32 = arith.constant 0 : i32
    %c0_i32_0 = arith.constant 0 : i32
    return %arg0, %c0_i32, %arg1 : i32, i32, i32
  }
  func.func @transform_1(%arg0: i32, %arg1: i32) -> (i32, i32, i32) {
    %c1_i32 = arith.constant 1 : i32
    %0 = arith.addi %arg1, %c1_i32 : i32
    %c0_i32 = arith.constant 0 : i32
    %c0_i32_0 = arith.constant 0 : i32
    return %arg0, %c0_i32, %0 : i32, i32, i32
  }
  func.func @transform_2(%arg0: i32, %arg1: i32) -> (i32, i32) {
    %c0_i32 = arith.constant 0 : i32
    %c0_i32_0 = arith.constant 0 : i32
    %c0_i32_1 = arith.constant 0 : i32
    return %c0_i32, %c0_i32_0 : i32, i32
  }
  func.func @transform_3(%arg0: i32, %arg1: i32) -> (i32, i32) {
    %c0_i32 = arith.constant 0 : i32
    %c0_i32_0 = arith.constant 0 : i32
    %c0_i32_1 = arith.constant 0 : i32
    return %c0_i32, %c0_i32_0 : i32, i32
  }
  func.func @transform_4(%arg0: i32, %arg1: i32) -> (i32, i32) {
    %c0_i32 = arith.constant 0 : i32
    %c0_i32_0 = arith.constant 0 : i32
    %c0_i32_1 = arith.constant 0 : i32
    return %c0_i32, %c0_i32_0 : i32, i32
  }
  func.func @transform_5(%arg0: i32, %arg1: i32) -> i32 {
    %c0_i32 = arith.constant 0 : i32
    %c0_i32_0 = arith.constant 0 : i32
    return %c0_i32 : i32
  }
  func.func @transform_6(%arg0: i32, %arg1: i32) -> (i32, i32, i32) {
    %c0_i32 = arith.constant 0 : i32
    %c0_i32_0 = arith.constant 0 : i32
    return %arg0, %c0_i32, %arg1 : i32, i32, i32
  }
}

</mosaic_0001>

<bundles_post_ra>
// kernel: tpu_custom_call.1
= control target key start
LH: loop header
LB: loop body
LE: loop exit
PB: predicated region body
PF: predicated region fallthrough
CT: control target
= control target key end

     0   :  { %s1370_s0 = inlined_call_operand.hbm [shape: f32[2,4,512], index: 0, kind: input, shape index: {}]   ;;  %s1371_s1 = inlined_call_operand.hbm [shape: f32[2,4,512], index: 1, kind: input, shape index: {}]   ;;  %s1372_s2 = inlined_call_operand.vmem [shape: bf16[8,36], index: 2, kind: input, shape index: {}]   ;;  %s1373_s3 = inlined_call_operand.vmem [shape: f32[8,1], index: 3, kind: input, shape index: {}]   ;;  %s1374_s4 = inlined_call_operand.vmem [shape: f32[8,1], index: 4, kind: input, shape index: {}]   ;;  %s1375_s5 = inlined_call_operand.<no memory space> [shape: f32[1], index: 5, kind: input, shape index: {}]   ;;  %s1376_s6 = inlined_call_operand.hbm [shape: f32[2,8,384], index: 6, kind: output, shape index: {}]  }
   0x1   :  { %1389 = sst [smem:[#allocation17_spill]] %s1370_s0 }
   0x2   :  { %1390 = sst [smem:[#allocation18_spill]] %s1372_s2 }
   0x3   :  { %1391 = sst [smem:[#allocation19_spill]] %s1376_s6 }
   0x4   :  { %11 = sst [smem:[#allocation2]] %s1375_s5 }
   0x5   :  { %12 = vsyncpa [#allocation4], 0 }
   0x6   :  { %14 = vsyncpa [#allocation4 + $0x1], 0 }
   0x7   :  { %15 = vsyncpa [#allocation7], 0 }
   0x8   :  { %17 = vsyncpa [#allocation7 + $0x1], 0 }
   0x9   :  { %18 = vsyncpa [#allocation5], 0 }
   0xa   :  { %20 = vsyncpa [#allocation5 + $0x1], 0  ;;  %s1033_s23 = smov 0   ;;  %s1035_s24 = smov 0  }
   0xb   :  { %s1037_s25 = smov 0   ;;  %s1039_s26 = smov 0  }
   0xc   :  { %s1041_s27 = smov 0   ;;  %s1043_s28 = smov 0  }
   0xd   :  { %s1045_s29 = smov 0   ;;  %s1047_s5 = smov 0  }
   0xe   :  { %s1049_s30 = smov 0   ;;  %s1051_s7 = smov 0  }
   0xf   :  { %s1053_s8 = smov 0  }
  0x10 LB: > { %1392 = sst [smem:[#allocation12_spill]] %s971_s30  ;;  %s598_s9 = sadd.s32 4294967295, %s979_s8   ;;  %s979_s8 = sphi %s1053_s8, %s26_s8   ;;  %s975_s7 = sphi %s1051_s7, %s1424_s7   ;;  %s971_s30 = sphi %s1049_s30, %s1423_s30   ;;  %s967_s5 = sphi %s1047_s5, %s1422_s5   ;;  %s963_s29 = sphi %s1045_s29, %s1421_s29   ;;  %s959_s28 = sphi %s1043_s28, %s1430_s28   ;;  %s955_s27 = sphi %s1041_s27, %s1429_s27   ;;  %s951_s26 = sphi %s1039_s26, %s1428_s26   ;;  %s947_s25 = sphi %s1037_s25, %s1427_s25   ;;  %s943_s24 = sphi %s1035_s24, %s1426_s24   ;;  %s939_s23 = sphi %s1033_s23, %s1425_s23  }
  0x11   : > { %1393 = sst [smem:[#allocation13_spill]] %s975_s7  ;;  %s599_s10 = sadd.s32 4294967294, %s979_s8  }
  0x12   : > { %s35_s11 = sadd.s32 1, %s971_s30  ;;  %s38_s12 = sadd.s32 1, %s975_s7 }
  0x13   : > { %p36_p0 = scmp.ge.s32.totalorder %s35_s11, 3  ;;  %s47_s13 = sadd.s32 1, %s959_s28 }
  0x14   : > { %p54_p1 = scmp.ne.s32.totalorder %s959_s28, %s955_s27  ;;  %p1380_p2 = scmp.eq.s32.totalorder %s979_s8, 0 }
  0x15   : > { %s1096_s14 = scalar_select %p36_p0, 0, %s35_s11  }
  0x16   : > { %s1432_s12 = smov (!%p36_p0, %s38_s12), %s975_s7  ;;  %p1106_p3 = por %p1380_p2, %p54_p1 }
  0x17   : > { %1394 = sst [smem:[#allocation14_spill]] %s1096_s14  ;;  %s43_s15 = ssub.s32 %s971_s30, %s1096_s14 }
  0x18   : > { %p40_p4 = scmp.ge.s32.totalorder %s1432_s12, 2  ;;  %p60_p5 = scmp.ne.s32.totalorder %s955_s27, %s951_s26 }
  0x19   : > { %p1112_p6 = scmp.eq.s32.totalorder %s598_s9, 0  ;;  %s71_s18 = sadd.s32 1, %s1096_s14 }
  0x1a   : > { %s1434_s12 = smov (%p40_p4, %s1432_s12), 0  ;;  %s73_s20 = ssub.s32 %s35_s11, %s71_s18 }
  0x1b   : > { %s1396_s17 = scalar_select %p1112_p6, 1, 0 }
  0x1c   : > { %1397 = sst [smem:[#allocation15_spill]] %s1434_s12  ;;  %p1124_p7 = por %p1112_p6, %p60_p5 }
  0x1d   : > { %s42_s21 = ssub.s32 %s975_s7, %s1434_s12  ;;  %p200_p8 = scmp.eq.s32.totalorder %s598_s9, 5 }
  0x1e   : > { %s1398_s19 = scalar_select %p1124_p7, 1, 0 }
  0x1f   : > { %s44_s22 = sor.u32 %s43_s15, %s42_s21  ;;  %s74_s6 = sor.u32 %s73_s20, %s42_s21 }
  0x20   : > { %p45_p9 = scmp.eq.s32.totalorder %s44_s22, 0  ;;  %p1130_p10 = scmp.eq.s32.totalorder %s74_s6, 0 }
  0x21   : > { %p1137_p11 = por %p200_p8, %p54_p1  ;;  %p206_p12 = scmp.eq.s32.totalorder %s599_s10, 5 }
  0x22   : > { %s1142_s11 = scalar_select %p45_p9, %s959_s28, %s47_s13  }
  0x23   : > { %s1400_s2 = scalar_select %p1137_p11, 1, 0 }
  0x24   : > { %1401 = sst [smem:[#allocation16_spill]] %s1142_s11  ;;  %p1147_p13 = por %p206_p12, %p60_p5 }
  0x25   : > { %p1383_p0 = scmp.lt.s32.totalorder %s979_s8, 6  ;;  %s238_s6 = sand.u32 1, %s959_s28  }
  0x26   : > { %s1402_s9 = scalar_select %p1147_p13, 1, 0 }
  0x27   : > { %s602_s15 = sshll.u32 %s238_s6, 2  ;;  %s603_s18 = sshll.u32 %s975_s7, 2 }
  0x28   : > { %s1155_s20 = sadd.s32 %s971_s30, %s603_s18  ;;  %s242_s21 = scalar_lea.vmem [#allocation3], %s602_s15 }
  0x29   : > { %s251_s22 = sshll.u32 %s242_s21, 4  ;;  %s1381_s12 = sshll.u32 %s1155_s20, 6  ;;  %s1158_s22 = int_to_ptr.vmem [resolvable:$true] %s251_s22 }
  0x2a   : > { %s1403_s0 = sld [smem:[#allocation17_spill]]  ;;  %p1171_p1 = pnand %p1383_p0, %p1106_p3 }
  0x2b   : > { %s239_s15 = scalar_lea.sflag [#allocation4], %s238_s6 }
  0x2c   : > { %p794_p9 = pneg %p1171_p1 }
  0x30   : > { %s1165_s11 = scalar_lea.hbm %s1403_s0, %s1381_s12  ;;  %s797_s13 = scalar_lea.hbm %s1403_s0, 512 }
  0x31   : > { %s792_s21 = scalar_lea.hbm %s1165_s11, 64  ;;  %p798_p3 = scmp.lt.u32.totalorder %s1165_s11, %s1403_s0 }
  0x32   : > { %p793_p8 = scmp.ne.s32.totalorder %s1165_s11, %s792_s21  ;;  %p799_p0 = scmp.lt.u32.totalorder %s797_s13, %s792_s21 }
  0x33   : > { %p801_p5 = scmp.lt.u32.totalorder %s792_s21, %s1165_s11 }
  0x34   : > { %p795_p12 = pnand %p794_p9, %p793_p8  ;;  %p800_p4 = por %p799_p0, %p798_p3 }
  0x36   : > { %p796_p2 = pneg %p795_p12  ;;  %p802_p13 = por %p801_p5, %p800_p4 }
  0x38   : > { %p803_p11 = pnand %p802_p13, %p796_p2 }
  0x3a   : > { %806 = shalt.err (!%p803_p11)
}
  0x3b   : > { %s807_s6 = scalar_lea.vmem %s1158_s22, 64  ;;  %s981_s16 = smov [#allocation3]  }
  0x3c   : > { %p808_p8 = scmp.ne.s32.totalorder %s1158_s22, %s807_s6  ;;  %s812_s10 = sshll.u32 %s981_s16, 4  ;;  %s813_s10 = int_to_ptr.vmem [resolvable:$false] %s812_s10 }
  0x3d   : > { %s814_s7 = scalar_lea.vmem %s813_s10, 128  ;;  %p815_p6 = scmp.lt.s32.totalorder %s1158_s22, %s813_s10 }
  0x3e   : > { %p810_p12 = pnand %p808_p8, %p794_p9  ;;  %p816_p0 = scmp.lt.s32.totalorder %s814_s7, %s807_s6 }
  0x40   : > { %p811_p7 = pneg %p810_p12  ;;  %p817_p3 = por %p816_p0, %p815_p6 }
  0x42   : > { %p818_p4 = pnand %p817_p3, %p811_p7 }
  0x44   : > { %821 = shalt.err (!%p818_p4)
}
  0x45   : > { %641 = dma.hbm_to_vmem [thread:$0]  (!%p1171_p1), %s1165_s11, 64, %s1158_s22, %s239_s15  }
  0x46   : > { %p1405_p2 = scmp.lt.s32.totalorder %s979_s8, 7  ;;  %p1406_p6 = scmp.ge.s32.totalorder %s979_s8, 1 }
  0x47   : > { %s77_s18 = sadd.s32 1, %s947_s25  ;;  %p84_p11 = scmp.ne.s32.totalorder %s947_s25, %s943_s24 }
  0x48   : > { %p1206_p7 = pnand %p1406_p6, %p1405_p2  ;;  %p1408_p13 = scmp.eq.s32.totalorder %s979_s8, 0 }
  0x49   : > { %s1216_s21 = scalar_select %p1130_p10, %s947_s25, %s77_s18  }
  0x4a   : > { %p86_p5 = por %p84_p11, %p1408_p13  ;;  %p90_p9 = scmp.ne.s32.totalorder %s943_s24, %s939_s23 }
  0x4b   : > { %s258_s13 = sand.u32 1, %s947_s25   ;;  %s1409_s6 = sshll.u32 %s1155_s20, 6 }
  0x4c   : > { %s527_s11 = scalar_lea.hbm %s1371_s1, %s1409_s6  ;;  %p1410_p1 = scmp.ne.s32.totalorder %s1396_s17, 0 }
  0x4d   : > { %s605_s15 = sshll.u32 %s258_s13, 2  ;;  %s1234_s7 = scalar_lea.hbm %s527_s11, 64 }
  0x4e   : > { %p1230_p8 = por %p90_p9, %p1410_p1  ;;  %p1412_p12 = scmp.lt.s32.totalorder %s979_s8, 6 }
  0x4f   : > { %s262_s14 = scalar_lea.vmem [#allocation6], %s605_s15  ;;  %s259_s17 = scalar_lea.sflag [#allocation7], %s258_s13 }
  0x50   : > { %s1411_s22 = scalar_select %p1230_p8, 1, 0 }
  0x51   : > { %p1238_p10 = pnand %p1412_p12, %p86_p5  ;;  %s272_s20 = sshll.u32 %s262_s14, 4  ;;  %s1242_s20 = int_to_ptr.vmem [resolvable:$true] %s272_s20 }
  0x52   : > { %s852_s18 = scalar_lea.hbm %s527_s11, 128  ;;  %s827_s10 = scalar_lea.hbm %s1371_s1, 512 }
  0x53   : > { %p823_p0 = scmp.ne.s32.totalorder %s1234_s7, %s852_s18  ;;  %p824_p3 = pneg %p1238_p10 }
  0x54   : > { %p828_p6 = scmp.lt.u32.totalorder %s1234_s7, %s1371_s1  ;;  %p829_p11 = scmp.lt.u32.totalorder %s827_s10, %s852_s18 }
  0x55   : > { %p825_p4 = pnand %p824_p3, %p823_p0  ;;  %p831_p5 = scmp.lt.u32.totalorder %s852_s18, %s1234_s7 }
  0x56   : > { %p830_p13 = por %p829_p11, %p828_p6 }
  0x57   : > { %p826_p2 = pneg %p825_p4 }
  0x58   : > { %p832_p9 = por %p831_p5, %p830_p13 }
  0x5a   : > { %p833_p1 = pnand %p832_p9, %p826_p2 }
  0x5c   : > { %836 = shalt.err (!%p833_p1)
}
  0x5d   : > { %s837_s13 = scalar_lea.vmem %s1242_s20, 64  ;;  %s982_s11 = smov [#allocation6]  }
  0x5e   : > { %p838_p12 = scmp.ne.s32.totalorder %s1242_s20, %s837_s13  ;;  %s842_s15 = sshll.u32 %s982_s11, 4  ;;  %s843_s15 = int_to_ptr.vmem [resolvable:$false] %s842_s15 }
  0x5f   : > { %s844_s0 = scalar_lea.vmem %s843_s15, 128  ;;  %p845_p8 = scmp.lt.s32.totalorder %s1242_s20, %s843_s15 }
  0x60   : > { %p840_p0 = pnand %p838_p12, %p824_p3  ;;  %p846_p6 = scmp.lt.s32.totalorder %s844_s0, %s837_s13 }
  0x62   : > { %p841_p4 = pneg %p840_p0  ;;  %p847_p11 = por %p846_p6, %p845_p8 }
  0x64   : > { %p848_p13 = pnand %p847_p11, %p841_p4 }
  0x66   : > { %851 = shalt.err (!%p848_p13)
}
  0x67   : > { %644 = dma.hbm_to_vmem [thread:$0]  (!%p1238_p10), %s1234_s7, 64, %s1242_s20, %s259_s17  }
  0x68   : > { %281 = sbr.rel (%p1206_p7) target bundleno = 492 (0x1ec), region = 44  ;;  %s1271_s30 = sand.u32 (!%p1206_p7), 1, %s955_s27  }
  0x69   : > { %s609_s14 = sshll.u32 (!%p1206_p7), %s1271_s30, 2  ;;  %s284_s18 = scalar_lea.sflag (!%p1206_p7), [#allocation4], %s1271_s30 }
  0x6a   : > { %s287_s6 = scalar_lea.vmem (!%p1206_p7), [#allocation3], %s609_s14  ;;  %p1414_p8 = scmp.ne.s32.totalorder (!%p1206_p7), %s1398_s19, 0 }
  0x6f   : > { %926 = dma.done.wait (%p1414_p8), %s284_s18, 64  }
  0x70   : > { %928 = vsyncadd (%p1414_p8), %s284_s18, 4294967232  ;;  %s292_s7 = sand.u32 1, %s943_s24   ;;  %p1415_p7 = scmp.ne.s32.totalorder %s1411_s22, 0 }
  0x71   : > { %s610_s23 = sshll.u32 %s292_s7, 2  ;;  %s293_s12 = scalar_lea.sflag [#allocation7], %s292_s7 }
  0x72   : > { %s296_s20 = scalar_lea.vmem [#allocation6], %s610_s23 }
  0x73   : > { %930 = dma.done.wait (%p1415_p7), %s293_s12, 64  }
  0x74   : > { %932 = vsyncadd (%p1415_p7), %s293_s12, 4294967232  ;;  %v983_v0 = vmov 0.0   ;;  %v332_v1 = vld [vmem:[%s287_s6] sm:$0xf]  ;;  %v333_v2 = vld [vmem:[%s296_s20] sm:$0xf] }
  0x75   : > { %621 = vmatprep.subr.bf16.mxu0 %v983_v0  ;;  %v755_v3 = vpack.i.bf16 %v333_v2, %v332_v1  ;;  %v336_v4 = vrot.slane %v332_v1, 4  ;;  %v337_v5 = vrot.slane %v333_v2, 4  ;;  %s984_s19 = smov 109   ;;  %s985_s17 = smov 126   ;;  %vm990_vm0 = vmmov 0   ;;  %v451_v8 = vld [vmem:[%s1373_s3] sm:$0xff] }
  0x76   : > { %s986_s16 = smov 110   ;;  %s987_s10 = smov 127   ;;  %627 = vmatprep.mubr.msk.bf16.mxu0 %vm990_vm0, %v983_v0  ;;  %v993_v7 = vmov 0   ;;  %v458_v9 = vld [vmem:[%s1374_s4] sm:$0xff]  ;;  %vm342_vm1 = vcmask 1039360   ;;  %vm349_vm2 = vcmask 1031168  }
  0x77   : > { %756 = vrot.lane.b32.xlu1 %v755_v3, %s984_s19  ;;  %751 = vrot.lane.b32.xlu0 %v755_v3, %s985_s17  ;;  %v765_v6 = vpack.i.bf16 %v337_v5, %v336_v4  ;;  %s988_s13 = smov 108   ;;  %s989_s22 = smov 92   ;;  %vm356_vm3 = vcmask 900096   ;;  %vm394_vm4 = vcmask 1043456   ;;  %vm370_vm5 = vcmask 883712  }
  0x78   : > { %s991_s11 = smov 91   ;;  %s992_s15 = smov 90   ;;  %790 = vset.pattern.permute.xlu0 %v993_v7  ;;  %791 = vset.pattern.permute.xlu1 %v993_v7  ;;  %vm377_vm6 = vcmask 752640   ;;  %vm363_vm7 = vcmask 891904   ;;  %vm384_vm8 = vcmask 744448   ;;  %vm391_vm9 = vcmask 736256  }
  0x79   : > { %vm407_vm10 = vcmask 1041408   ;;  %s1416_s12 = sld [smem:[#allocation18_spill]]  ;;  %vm403_vm11 = vcmask 293888   ;;  %s465_s20 = sld [smem:[#allocation2]] }
  0x7a   : > { %s631_s19 = smul.u32 3, %s967_s5  ;;  %s611_s17 = sshll.u32 %s1271_s30, 3 }
  0x7b   : > { %766 = vrot.lane.b32.xlu1 %v765_v6, %s986_s16  ;;  %761 = vrot.lane.b32.xlu0 %v765_v6, %s987_s10  ;;  %p1418_p3 = scmp.ne.s32.totalorder %s1400_s2, 0  ;;  %s994_s18 = smov [#allocation8]  }
  0x7c   : > { %s483_s16 = sadd.s32 %s963_s29, %s631_s19  ;;  %s472_s29 = scalar_lea.sflag [#allocation5], %s1271_s30 }
  0x7d   : > { %s614_s10 = sshll.u32 %s483_s16, 7  ;;  %s857_s6 = sshll.u32 %s994_s18, 4  ;;  %s858_s6 = int_to_ptr.vmem [resolvable:$false] %s857_s6 }
  0x7e   : > { %s859_s7 = scalar_lea.vmem %s858_s6, 256 }
  0x7f   : > { %776 = vrot.lane.b32.xlu0 %v765_v6, %s988_s13  ;;  %771 = vrot.lane.b32.xlu1 %v755_v3, %s989_s22  ;;  %v402_v50 = vld [vmem:[%s1416_s12] sm:$0xf]  ;;  %v467_v56 = vstv %s465_s20  ;;  %s329_s13 = scalar_lea.vmem [#allocation8], %s611_s17 }
  0x80   : > { %s487_s22 = sshll.u32 %s329_s13, 4  ;;  %s1309_s22 = int_to_ptr.vmem [resolvable:$true] %s487_s22 }
  0x81   : > { %s853_s14 = scalar_lea.vmem %s1309_s22, 128  ;;  %p860_p9 = scmp.lt.s32.totalorder %s1309_s22, %s858_s6 }
  0x82   : > { %p854_p10 = scmp.ne.s32.totalorder %s1309_s22, %s853_s14  ;;  %p861_p1 = scmp.lt.s32.totalorder %s859_s7, %s853_s14 }
  0x83   : > { %781 = vrot.lane.b32.xlu0 %v765_v6, %s991_s11  ;;  %786 = vrot.lane.b32.xlu1 %v755_v3, %s992_s15  ;;  %s1417_s15 = sld [smem:[#allocation19_spill]] }
  0x84   : > { %p855_p2 = pnand %p854_p10, %p1418_p3  ;;  %p862_p12 = por %p861_p1, %p860_p9 }
  0x86   : > { %p856_p5 = pneg %p855_p2 }
  0x87   : > { %454 = vperm.xlu0 %790, %v451_v8   ;;  %461 = vperm.xlu1 %791, %v458_v9  }
  0x88   : > { %p863_p0 = pnand %p862_p12, %p856_p5 }
  0x89   : > { %s1307_s0 = scalar_lea.hbm %s1417_s15, %s614_s10 }
  0xe9   : > { %v757_v10 = vpop.permute.xlu1 %756  ;;  %v752_v11 = vpop.permute.xlu0 %751 }
  0xea   : > { %v754_v12 = vunpack.i.h.bf16 %v752_v11  ;;  %v753_v13 = vunpack.i.l.bf16 %v752_v11  ;;  %v759_v32 = vunpack.i.h.bf16 %v757_v10  ;;  %v758_v33 = vunpack.i.l.bf16 %v757_v10 }
  0xec   : > { %v350_v21 = vsel %vm349_vm2, %v753_v13, %v754_v12  ;;  %v364_v42 = vsel %vm363_vm7, %v758_v33, %v759_v32 }
  0xed   : > { %v767_v14 = vpop.permute.xlu1 %766  ;;  %v762_v15 = vpop.permute.xlu0 %761 }
  0xee   : > { %v769_v16 = vunpack.i.h.bf16 %v767_v14  ;;  %v768_v17 = vunpack.i.l.bf16 %v767_v14  ;;  %v764_v18 = vunpack.i.h.bf16 %v762_v15  ;;  %v763_v19 = vunpack.i.l.bf16 %v762_v15 }
  0xf0   : > { %v343_v20 = vsel %vm342_vm1, %v763_v19, %v764_v18  ;;  %v357_v22 = vsel %vm356_vm3, %v768_v17, %v769_v16 }
  0xf1   : > { %v777_v23 = vpop.permute.xlu0 %776  ;;  %v395_v24 = vsel %vm394_vm4, %v332_v1, %v343_v20  ;;  %v396_v25 = vsel %vm394_vm4, %v350_v21, %v357_v22  ;;  %v772_v26 = vpop.permute.xlu1 %771 }
  0xf2   : > { %v779_v27 = vunpack.i.h.bf16 %v777_v23  ;;  %v778_v28 = vunpack.i.l.bf16 %v777_v23  ;;  %v399_v29 = vpack.c.bf16 %v396_v25, %v395_v24  ;;  %v774_v30 = vunpack.i.h.bf16 %v772_v26 }
  0xf3   : > { %v773_v31 = vunpack.i.l.bf16 %v772_v26 }
  0xf4   : > { %622 = vmatpush3.bf16.msra.mxu0 %v399_v29  ;;  %v371_v34 = vsel %vm370_vm5, %v778_v28, %v779_v27 }
  0xf5   : > { %v378_v35 = vsel %vm377_vm6, %v773_v31, %v774_v30  ;;  %v782_v36 = vpop.permute.xlu0 %781  ;;  %v787_v37 = vpop.permute.xlu1 %786  ;;  %623 = vmatprep.subr.bf16.mxu0 %v983_v0  ;;  %v397_v45 = vsel %vm394_vm4, %v364_v42, %v371_v34 }
  0xf6   : > { %v784_v38 = vunpack.i.h.bf16 %v782_v36  ;;  %v783_v39 = vunpack.i.l.bf16 %v782_v36  ;;  %v789_v40 = vunpack.i.h.bf16 %v787_v37  ;;  %v788_v41 = vunpack.i.l.bf16 %v787_v37 }
  0xf8   : > { %v385_v43 = vsel %vm384_vm8, %v783_v39, %v784_v38  ;;  %v392_v44 = vsel %vm391_vm9, %v788_v41, %v789_v40 }
  0xf9   : > { %v398_v46 = vsel %vm394_vm4, %v378_v35, %v385_v43  ;;  %v401_v47 = vpack.c.bf16 %v392_v44, %v392_v44 }
  0xfa   : > { %v400_v48 = vpack.c.bf16 %v398_v46, %v397_v45 }
  0xfb   : > { %v409_v49 = vsel %vm407_vm10, %v401_v47, 0 }
  0xfc   : > { %624 = vmatpush3.bf16.msra.mxu0 %v400_v48 }
  0xfd   : > { %625 = vmatprep.subr.bf16.mxu0 %v983_v0 }
 0x100   : > { %626 = vmatpush3.bf16.msra.mxu0 %v409_v49 }
 0x103   : > { %628 = vmatmul.mubr.msk.bf16.vlgmr.msra.gmra.mrb[0].mxu0 %vm403_vm11, %v402_v50 }
 0x106   : > { %v455_v51 = vpop.permute.xlu0 %454  ;;  %v462_v53 = vpop.permute.xlu1 %461 }
 0x1d6   : > { %v445_v52 = vpop.f32.mrb[0].mxu0 }
 0x1d7   : > { %v457_v54 = vmul.f32 %v455_v51, %v445_v52  ;;  %v629_v55 = vpop.f32.mrb[1].mxu0 }
 0x1d8   : > { %v448_v57 = vpop.f32.mrb[2].mxu0 }
 0x1d9   : > { %v464_v58 = vadd.f32 %v462_v53, %v457_v54  ;;  %v630_v59 = vpop.f32.mrb[3].mxu0 }
 0x1db   : > { %vm466_vm12 = vcmp.ge.f32.partialorder %v464_v58, 0.0  ;;  %v468_v60 = vmul.f32 %v467_v56, %v464_v58 }
 0x1dd   : > { %v469_v61 = vsel %vm466_vm12, %v464_v58, %v468_v60 }
 0x1de   : > { %470 = vst [vmem:[%s329_s13] sm:$0xff] %v469_v61 }
 0x1df   : > { %866 = shalt.err (!%p863_p0)
}
 0x1e0   : > { %s867_s30 = scalar_lea.hbm %s1307_s0, 128  ;;  %s871_s20 = scalar_lea.hbm %s1417_s15, 768 }
 0x1e1   : > { %p868_p4 = scmp.ne.s32.totalorder %s1307_s0, %s867_s30  ;;  %p872_p13 = scmp.lt.u32.totalorder %s1307_s0, %s1417_s15 }
 0x1e2   : > { %p873_p8 = scmp.lt.u32.totalorder %s871_s20, %s867_s30  ;;  %p875_p10 = scmp.lt.u32.totalorder %s867_s30, %s1307_s0 }
 0x1e3   : > { %p869_p6 = pnand %p868_p4, %p1418_p3 }
 0x1e4   : > { %p874_p7 = por %p873_p8, %p872_p13 }
 0x1e5   : > { %p870_p11 = pneg %p869_p6 }
 0x1e6   : > { %p876_p2 = por %p875_p10, %p874_p7 }
 0x1e8   : > { %p877_p5 = pnand %p876_p2, %p870_p11 }
 0x1ea   : > { %880 = shalt.err (!%p877_p5)
}
 0x1eb   : > { %636 = dma.vmem_to_hbm [thread:$0]  (%p1418_p3), %s1309_s22, 128, %s1307_s0, %s472_s29  }
 0x1ec PF: > { %p650_p9 = scmp.ge.s32.totalorder %s979_s8, 2  ;;  %s499_s16 = sand.u32 1, %s951_s26  }
 0x1ed   : > { %p1419_p1 = scmp.ne.s32.totalorder %s1402_s9, 0  ;;  %s500_s10 = scalar_lea.sflag [#allocation5], %s499_s16 }
 0x1ef   : > { %p646_p12 = pnand %p650_p9, %p1419_p1 }
 0x1f1   : > { %934 = dma.done.wait (!%p646_p12), %s500_s10, 128  }
 0x1f2   : > { %936 = vsyncadd (!%p646_p12), %s500_s10, 4294967168  ;;  %s26_s8 = sadd.s32 1, %s979_s8   ;;  %s1420_s2 = sld [smem:[#allocation16_spill]] }
 0x1f3   : > { %p23_p0 = scmp.ge.s32.totalorder %s26_s8, 8   ;;  %s1421_s29 = sld [smem:[#allocation12_spill]] }
 0x1f4   : > { %s1422_s5 = sld [smem:[#allocation13_spill]]  ;;  %s1423_s30 = sld [smem:[#allocation14_spill]] }
 0x1f5   : > { %s1424_s7 = sld [smem:[#allocation15_spill]]  ;;  %s1425_s23 = smov %s943_s24 }
 0x1f6   : > { %s1426_s24 = smov %s947_s25  ;;  %s1427_s25 = smov %s1216_s21 }
 0x1f7   : > { %s1428_s26 = smov %s955_s27  ;;  %s1429_s27 = smov %s959_s28 }
 0x1f8   : > { %s1430_s28 = smov %s1420_s2  ;;  %25 = sbr.rel (!%p23_p0) target bundleno = 16 (0x10), region = 102 }
 0x1ff   :  { %505 = vsyncpa [#allocation4], 1 }
 0x200   :  { %507 = vsyncpa [#allocation4 + $0x1], 1 }
 0x201   :  { %508 = vsyncpa [#allocation7], 1 }
 0x202   :  { %510 = vsyncpa [#allocation7 + $0x1], 1 }
 0x203   :  { %511 = vsyncpa [#allocation5], 1 }
 0x204   :  { %513 = vsyncpa [#allocation5 + $0x1], 1 }

</bundles_post_ra>
